<compile_context>
chip_gen: v7x
topology: tpu7x:2x2x1
jax: 0.10.0
libtpu: 0.0.40
codegen_flags: <defaults>
</compile_context>

<pallas_src>
import functools

import jax
import jax.numpy as jnp
from jax import lax
from jax.experimental import pallas as pl
from jax.experimental.pallas import tpu as pltpu


def _round_up(x, m):
    return (x + m - 1) // m * m


def _vmem_limit_bytes():
    """Scoped-VMEM limit per generation (128 MiB v5e/v6e, 64 MiB v7x)."""
    try:
        cap = pltpu.get_tpu_info().vmem_capacity_bytes
    except Exception:
        cap = 64 * 1024 * 1024          # conservative (v7x physical)
    return min(int(cap * 3 // 4), 100 * 1024 * 1024)


def _pick_node_tile(n_pad, g_pad, vmem_budget):
    """Pick the A_hat row-block height (nodes per grid step) + buffer count.

    Budget counts: buffered bf16 A row blocks, the resident single-buffered
    (X@W)^T, double-buffered output blocks, and slack for f32 temporaries.
    n_pad is always a multiple of 256 so 256/128 always divide.
    """
    for t in (2048, 1024, 512, 256, 128):
        if n_pad % t != 0:
            continue
        bufs = 3 if t == 128 else 2          # keep HBM back-to-back on tiny tiles
        a_bytes = bufs * t * n_pad * 2       # bf16 A row blocks
        xw_bytes = g_pad * n_pad * 2         # resident projected activations
        out_bytes = 2 * g_pad * t * 4        # double-buffered output blocks
        tmp_bytes = 4 * g_pad * t * 4 + (1 << 20)
        if a_bytes + xw_bytes + out_bytes + tmp_bytes <= vmem_budget:
            return t, bufs
    # Even a 128-row block does not fit -> graph is too big for the dense-A
    # path anyway (see CSR TODO above); return the minimum tile.
    return 128, 2


# ---------------------------------------------------------------------------
# Fused GCNConv aggregation kernel (projection already hoisted).
#   xw_ref : [G_pad, N_pad] bf16  (X @ W)^T, resident, single-buffered
#   a_ref  : [T, N_pad]     bf16  row block of A_hat (rows = output nodes)
#   b_ref  : [G_pad, 1]     f32   bias column
#   o_ref  : [G_pad, T]           output block (feature-major, lane-dense)
#
#   out[g, t] = sum_n xw[g, n] * a[t, n]  ==  ((X W)^T @ A_hat^T) block,
#   i.e. the A_hat^T is expressed via dot_general contraction dims instead of
#   an HBM transpose; A_hat row blocks are contiguous in HBM.
# ---------------------------------------------------------------------------
def gcn_agg_kernel(xw_ref, a_ref, b_ref, o_ref, *, n_valid_rows,
                   apply_relu, apply_log_softmax):
    out = lax.dot_general(
        xw_ref[...], a_ref[...],
        dimension_numbers=(((1,), (1,)), ((), ())),
        preferred_element_type=jnp.float32)                      # [G_pad, T]
    out = out + b_ref[...]

    if apply_relu:
        out = jnp.maximum(out, 0.0)                              # f32 VPU

    if apply_log_softmax:
        # log_softmax over classes (= sublane axis). Padded class rows are
        # masked out so they do not pollute the reduction; they are sliced
        # off in the wrapper.
        if n_valid_rows < out.shape[0]:
            rows = lax.broadcasted_iota(jnp.int32, out.shape, 0)
            out = jnp.where(rows < n_valid_rows, out, -1e30)
        m = jnp.max(out, axis=0, keepdims=True)
        z = out - m
        lse = jnp.log(jnp.sum(jnp.exp(z), axis=0, keepdims=True))
        out = z - lse

    o_ref[...] = out.astype(o_ref.dtype)


def gcn_aggregate(xw_t, a_bf, b_col, *, n_valid_rows, apply_relu=False,
                  apply_log_softmax=False, out_dtype=jnp.float32):
    """post_op((X @ W)^T @ A_hat^T + b), column-tiled over nodes."""
    g_pad, n_pad = xw_t.shape
    assert a_bf.shape == (n_pad, n_pad)

    vmem_limit = _vmem_limit_bytes()
    tile_n, a_bufs = _pick_node_tile(n_pad, g_pad, vmem_limit)
    grid = (n_pad // tile_n,)

    kernel = functools.partial(
        gcn_agg_kernel, n_valid_rows=n_valid_rows,
        apply_relu=apply_relu, apply_log_softmax=apply_log_softmax)

    out_itemsize = jnp.dtype(out_dtype).itemsize
    cost = pl.CostEstimate(
        flops=2 * g_pad * n_pad * n_pad,
        transcendentals=(g_pad * n_pad) if apply_log_softmax else 0,
        bytes_accessed=(n_pad * n_pad * 2            # A_hat stream (dominant)
                        + g_pad * n_pad * 2          # resident (X@W)^T
                        + g_pad * n_pad * out_itemsize))

    return pl.pallas_call(
        kernel,
        out_shape=jax.ShapeDtypeStruct((g_pad, n_pad), out_dtype),
        grid_spec=pl.GridSpec(
            grid=grid,
            in_specs=[
                # (X @ W)^T: block index never changes -> single-buffer.
                pl.BlockSpec((g_pad, n_pad), lambda j: (0, 0),
                             pipeline_mode=pl.Buffered(1)),
                # A_hat row block: the only operand streamed from HBM.
                pl.BlockSpec((tile_n, n_pad), lambda j: (j, 0),
                             pipeline_mode=pl.Buffered(a_bufs)),
                # bias column: constant -> single-buffer.
                pl.BlockSpec((g_pad, 1), lambda j: (0, 0),
                             pipeline_mode=pl.Buffered(1)),
            ],
            out_specs=pl.BlockSpec((g_pad, tile_n), lambda j: (0, j)),
        ),
        compiler_params=pltpu.CompilerParams(
            # Node tiles are independent. On v7x the two TCs share the HBM
            # stream, so this hides per-step overhead, not bandwidth.
            dimension_semantics=("parallel",),
            vmem_limit_bytes=vmem_limit,
        ),
        cost_estimate=cost,
    )(xw_t, a_bf, b_col)


def gcn_forward(a_hat, x, w1, b1, w2, b2):
    """Two-layer GCN forward pass.
       x [N,F_in], a_hat [N,N] f32, w1 [F_in,H], b1 [H], w2 [H,C], b2 [C]."""
    n, _ = x.shape
    h_dim = w1.shape[1]
    c = w2.shape[1]
    n_pad = _round_up(n, 256)
    h_pad = _round_up(h_dim, 8)
    c_pad = _round_up(c, 8)

    # Single cast (+ zero pad) of A_hat to bf16 -- no transpose pass.
    # TODO(synk): emit bf16 (fp8 on v7x / int8 on v6e) directly from
    # build_normalized_adjacency to drop this pass too.
    a_bf = jnp.pad(a_hat.astype(jnp.bfloat16),
                   ((0, n_pad - n), (0, n_pad - n)))
    x_pad = jnp.pad(x, ((0, n_pad - n), (0, 0)))

    # ---- Layer 1: relu(A_hat @ X @ W1 + b1), feature-major bf16 output ----
    # Projection hoisted: tiny XLA matmul done once, not per grid step.
    xw1_t = jnp.pad(jnp.dot(x_pad, w1).T, ((0, h_pad - h_dim), (0, 0)))
    b1_col = jnp.pad(b1.reshape(-1, 1), ((0, h_pad - h_dim), (0, 0)))
    h_t = gcn_aggregate(xw1_t.astype(jnp.bfloat16), a_bf, b1_col,
                        apply_relu=True, n_valid_rows=h_dim,
                        out_dtype=jnp.bfloat16)           # [h_pad, n_pad]

    # Dropout: inference mode => identity.
    # TODO(synk): training-mode dropout needs pltpu.prng_seed/prng_random_bits.

    # ---- Layer 2: log_softmax(A_hat @ H @ W2 + b2) -----------------------
    xw2_t = jnp.pad(jnp.dot(w2.T, h_t[:h_dim].astype(jnp.float32)),
                    ((0, c_pad - c), (0, 0)))
    b2_col = jnp.pad(b2.reshape(-1, 1), ((0, c_pad - c), (0, 0)))
    out_t = gcn_aggregate(xw2_t.astype(jnp.bfloat16), a_bf, b2_col,
                          apply_log_softmax=True, n_valid_rows=c,
                          out_dtype=jnp.float32)          # [c_pad, n_pad]

    return out_t[:c, :n].T                                # back to [N, C]


def build_normalized_adjacency(edge_index, num_nodes):
    """Dense D^-1/2 (A + I) D^-1/2 matching PyG GCNConv's gcn_norm."""
    src, dst = edge_index[0], edge_index[1]
    a = jnp.zeros((num_nodes, num_nodes), jnp.float32)
    # message flows src -> dst : out[dst] += x[src]  =>  A[dst, src] += 1
    a = a.at[dst, src].add(1.0)
    eye = jnp.eye(num_nodes, dtype=jnp.float32)
    a = a * (1.0 - eye) + eye                             # fresh unit self-loops
    deg = jnp.sum(a, axis=1)
    d_inv_sqrt = jnp.where(deg > 0, 1.0 / jnp.sqrt(deg), 0.0)
    return d_inv_sqrt[:, None] * a * d_inv_sqrt[None, :]


def gcn_reference(a_hat, x, w1, b1, w2, b2):
    """Pure-JAX f32 reference of the PyTorch forward pass."""
    with jax.default_matmul_precision("float32"):
        h = jnp.maximum(a_hat @ (x @ w1) + b1, 0.0)
        logits = a_hat @ (h @ w2) + b2
        return jax.nn.log_softmax(logits, axis=1)


def glorot(key, shape):
    fan_in, fan_out = shape
    limit = jnp.sqrt(6.0 / (fan_in + fan_out))
    return jax.random.uniform(key, shape, jnp.float32, -limit, limit)


if __name__ == "__main__":
    N = 128          # number of nodes
    F_IN = 8         # dataset.num_node_features
    HIDDEN = 16
    C = 4            # dataset.num_classes
    E = 512          # number of directed edges

    key = jax.random.PRNGKey(0)
    k_x, k_src, k_dst, k_w1, k_w2 = jax.random.split(key, 5)

    # node features (data.x) and random edge_index (data.edge_index)
    x = jax.random.normal(k_x, (N, F_IN), jnp.float32)
    edge_index = jnp.stack([
        jax.random.randint(k_src, (E,), 0, N),
        jax.random.randint(k_dst, (E,), 0, N),
    ]).astype(jnp.int32)

    a_hat = build_normalized_adjacency(edge_index, N)

    # deterministic parameter init (GCNConv: weight [in, out], bias [out])
    w1 = glorot(k_w1, (F_IN, HIDDEN))
    b1 = jnp.zeros((HIDDEN,), jnp.float32)
    w2 = glorot(k_w2, (HIDDEN, C))
    b2 = jnp.zeros((C,), jnp.float32)

    out = jax.block_until_ready(gcn_forward(a_hat, x, w1, b1, w2, b2))
    ref = gcn_reference(a_hat, x, w1, b1, w2, b2)

    # Sanity checks.
    assert out.shape == (N, C)
    # log_softmax rows must exponentiate-sum to 1 (computed in f32 in-kernel).
    assert jnp.allclose(jnp.sum(jnp.exp(out), axis=1), 1.0, atol=1e-3)
    # Loose tolerance vs. the f32 reference: the adjacency matmuls
    # intentionally run in bf16 (f32 accumulation).
    err = jnp.abs(out - ref)
    assert float(jnp.max(err)) < 0.25, float(jnp.max(err))
    assert float(jnp.mean(err)) < 0.05, float(jnp.mean(err))

    print("KERNEL_OK")
</pallas_src>

<mosaic_0001>
module attributes {stable_mosaic.version = 11 : i64} {
  func.func @gcn_agg_kernel(%arg0: i32, %arg1: memref<16x256xbf16, #tpu.memory_space<vmem>>, %arg2: memref<256x256xbf16, #tpu.memory_space<vmem>>, %arg3: memref<16x1xf32, #tpu.memory_space<vmem>>, %arg4: memref<16x256xbf16, #tpu.memory_space<vmem>>) attributes {dimension_semantics = [#tpu.dimension_semantics<parallel>], iteration_bounds = array<i64: 1>, scalar_prefetch = 0 : i64, scratch_operands = 0 : i64, tpu.core_type = #tpu.core_type<tc>, window_params = [{pipeline_mode = #tpu.pipeline_mode<synchronous>, transform_indices = @transform_0, window_bounds = array<i64: 16, 256>}, {pipeline_mode = #tpu.pipeline_mode<double_buffered>, transform_indices = @transform_1, window_bounds = array<i64: 256, 256>}, {pipeline_mode = #tpu.pipeline_mode<synchronous>, transform_indices = @transform_2, window_bounds = array<i64: 16, 1>}, {transform_indices = @transform_3, window_bounds = array<i64: 16, 256>}]} {
    %c0 = arith.constant 0 : index
    %c0_0 = arith.constant 0 : index
    %0 = vector.load %arg1[%c0, %c0_0] : memref<16x256xbf16, #tpu.memory_space<vmem>>, vector<16x256xbf16>
    %c0_1 = arith.constant 0 : index
    %c0_2 = arith.constant 0 : index
    %1 = vector.load %arg2[%c0_1, %c0_2] : memref<256x256xbf16, #tpu.memory_space<vmem>>, vector<256x256xbf16>
    %cst = arith.constant dense<0.000000e+00> : vector<16x256xf32>
    %2 = tpu.matmul %0, %1, %cst {dimension_numbers = #tpu.dot_dimension_numbers<[1], [1], [0], [0], [0, 0, 1, 0], [], []>} : vector<16x256xbf16>, vector<256x256xbf16>, vector<16x256xf32> -> vector<16x256xf32>
    %c0_3 = arith.constant 0 : index
    %c0_4 = arith.constant 0 : index
    %3 = vector.load %arg3[%c0_3, %c0_4] : memref<16x1xf32, #tpu.memory_space<vmem>>, vector<16x1xf32>
    %4 = vector.broadcast %3 : vector<16x1xf32> to vector<16x256xf32>
    %5 = arith.addf %2, %4 : vector<16x256xf32>
    %cst_5 = arith.constant 0.000000e+00 : f32
    %6 = vector.broadcast %cst_5 : f32 to vector<16x256xf32>
    %7 = arith.maximumf %5, %6 : vector<16x256xf32>
    %8 = arith.truncf %7 : vector<16x256xf32> to vector<16x256xbf16>
    %c0_6 = arith.constant 0 : index
    %c0_7 = arith.constant 0 : index
    %9 = vector.load %arg4[%c0_6, %c0_7] : memref<16x256xbf16, #tpu.memory_space<vmem>>, vector<16x256xbf16>
    tpu.vector_store %arg4[%c0_6, %c0_7], %8 {strides = array<i32>} : memref<16x256xbf16, #tpu.memory_space<vmem>>, vector<16x256xbf16>,
    return
  }
  func.func @transform_0(%arg0: i32) -> (i32, i32) {
    %c0_i32 = arith.constant 0 : i32
    %c0_i32_0 = arith.constant 0 : i32
    %c0_i32_1 = arith.constant 0 : i32
    return %c0_i32, %c0_i32_0 : i32, i32
  }
  func.func @transform_1(%arg0: i32) -> (i32, i32) {
    %c0_i32 = arith.constant 0 : i32
    %c0_i32_0 = arith.constant 0 : i32
    return %arg0, %c0_i32 : i32, i32
  }
  func.func @transform_2(%arg0: i32) -> (i32, i32) {
    %c0_i32 = arith.constant 0 : i32
    %c0_i32_0 = arith.constant 0 : i32
    %c0_i32_1 = arith.constant 0 : i32
    return %c0_i32, %c0_i32_0 : i32, i32
  }
  func.func @transform_3(%arg0: i32) -> (i32, i32) {
    %c0_i32 = arith.constant 0 : i32
    %c0_i32_0 = arith.constant 0 : i32
    return %c0_i32, %arg0 : i32, i32
  }
}

</mosaic_0001>

<bundles_post_ra>
// kernel: tpu_custom_call.1
= control target key start
LH: loop header
LB: loop body
LE: loop exit
PB: predicated region body
PF: predicated region fallthrough
CT: control target
= control target key end

     0   :  { %8 = vsyncpa [#allocation3], 0  ;;  %s533_s0 = inlined_call_operand.vmem [shape: bf16[16,256], index: 0, kind: input, shape index: {}]   ;;  %s534_s1 = inlined_call_operand.hbm [shape: bf16[256,256], index: 1, kind: input, shape index: {}]   ;;  %s535_s2 = inlined_call_operand.vmem [shape: f32[16,1], index: 2, kind: input, shape index: {}]   ;;  %s536_s3 = inlined_call_operand.hbm [shape: bf16[16,256], index: 3, kind: output, shape index: {}]  }
   0x1   :  { %9 = vsyncpa [#allocation4], 0  ;;  %s466_s12 = smov [#allocation2]   ;;  %s418_s16 = scalar_lea.hbm %s534_s1, 4096 }
   0x2   :  { %s17_s13 = sshll.u32 %s466_s12, 4  ;;  %p419_p0 = scmp.ne.s32.totalorder %s534_s1, %s418_s16  ;;  %s18_s13 = int_to_ptr.vmem [resolvable:$true] %s17_s13 }
   0x3   :  { %p422_p1 = scmp.lt.u32.totalorder %s418_s16, %s534_s1 }
   0x5   :  { %p424_p2 = pnand %p422_p1, %p419_p0 }
   0x7   :  { %427 = shalt.err (!%p424_p2)
}
   0x8   :  { %s428_s21 = scalar_lea.vmem %s18_s13, 4096  ;;  %p433_p4 = scmp.lt.s32.totalorder %s18_s13, %s18_s13 }
   0x9   :  { %p429_p3 = scmp.ne.s32.totalorder %s18_s13, %s428_s21  ;;  %p434_p5 = scmp.lt.s32.totalorder %s428_s21, %s428_s21 }
   0xb   :  { %p435_p6 = por %p434_p5, %p433_p4 }
   0xd   :  { %p436_p7 = pnand %p435_p6, %p429_p3 }
   0xf   :  { %439 = shalt.err (!%p436_p7)
}
  0x10   :  { %s467_s22 = smov 128   ;;  %s468_s23 = smov 8  }
  0x11   :  { %23 = dma.hbm_to_vmem [thread:$0]  %s534_s1, 4096, %s18_s13, [#allocation3], %s467_s22, %s467_s22, %s468_s23  }
  0x12   :  { %462 = dma.done.wait [#allocation3], 4096  }
  0x13   :  { %463 = vsyncadd [#allocation3], 4294963200  ;;  %v367_v0 = vld [vmem:[#allocation2 + $0x4] ss:$8 sps:$4 sm:$0xff]   ;;  %v369_v1 = vld [vmem:[#allocation2] ss:$8 sps:$4 sm:$0xff]  }
  0x14   :  { %245 = vmatprep.subr.bf16.mxu0 %v367_v0  ;;  %v370_v2 = vld [vmem:[#allocation2 + $0x14] ss:$8 sps:$4 sm:$0xff]   ;;  %v469_v3 = vmov 0   ;;  %v372_v4 = vld [vmem:[#allocation2 + $0x10] ss:$8 sps:$4 sm:$0xff]   ;;  %v63_v9 = vld [vmem:[%s535_s2] sm:$0xff] }
  0x15   :  { %246 = vmatpush1.bf16.xpose.msra.mxu0 %v369_v1  ;;  %366 = vset.pattern.permute.xlu0 %v469_v3  ;;  %v373_v5 = vld [vmem:[#allocation2 + $0x24] ss:$8 sps:$4 sm:$0xff]   ;;  %v375_v6 = vld [vmem:[#allocation2 + $0x20] ss:$8 sps:$4 sm:$0xff]   ;;  %v376_v7 = vld [vmem:[#allocation2 + $0x34] ss:$8 sps:$4 sm:$0xff]  }
  0x16   :  { %247 = vmatprep.subr.bf16.mxu0 %v370_v2  ;;  %v417_v8 = vld [vmem:[%s533_s0 + $0x4] ss:$8 sps:$4 sm:$0xff]   ;;  %v378_v10 = vld [vmem:[#allocation2 + $0x30] ss:$8 sps:$4 sm:$0xff]   ;;  %67 = vperm.xlu0 %366, %v63_v9   ;;  %v381_v13 = vld [vmem:[#allocation2 + $0x40] ss:$8 sps:$4 sm:$0xff]  }
  0x17   :  { %v379_v11 = vld [vmem:[#allocation2 + $0x44] ss:$8 sps:$4 sm:$0xff]   ;;  %277 = vmatprep.mubr.bf16.mxu0 %v417_v8  ;;  %v382_v14 = vld [vmem:[#allocation2 + $0x54] ss:$8 sps:$4 sm:$0xff]   ;;  %v384_v15 = vld [vmem:[#allocation2 + $0x50] ss:$8 sps:$4 sm:$0xff]  }
  0x18   :  { %v64_v12 = vld [vmem:[%s535_s2 + $0x8] sm:$0xff]  ;;  %v388_v18 = vld [vmem:[#allocation2 + $0x74] ss:$8 sps:$4 sm:$0xff]   ;;  %v390_v19 = vld [vmem:[#allocation2 + $0x70] ss:$8 sps:$4 sm:$0xff]   ;;  %s470_s5 = smov [#allocation5]  }
  0x19   :  { %v385_v16 = vld [vmem:[#allocation2 + $0x64] ss:$8 sps:$4 sm:$0xff]   ;;  %v387_v17 = vld [vmem:[#allocation2 + $0x60] ss:$8 sps:$4 sm:$0xff]   ;;  %v394_v22 = vld [vmem:[#allocation2 + $0x94] ss:$8 sps:$4 sm:$0xff]  }
  0x1a   :  { %72 = vperm.xlu0 %366, %v64_v12   ;;  %v391_v20 = vld [vmem:[#allocation2 + $0x84] ss:$8 sps:$4 sm:$0xff]   ;;  %v393_v21 = vld [vmem:[#allocation2 + $0x80] ss:$8 sps:$4 sm:$0xff]   ;;  %v396_v23 = vld [vmem:[#allocation2 + $0x90] ss:$8 sps:$4 sm:$0xff]  }
  0x1b   :  { %v397_v24 = vld [vmem:[#allocation2 + $0xa4] ss:$8 sps:$4 sm:$0xff]   ;;  %v399_v25 = vld [vmem:[#allocation2 + $0xa0] ss:$8 sps:$4 sm:$0xff]   ;;  %v400_v26 = vld [vmem:[#allocation2 + $0xb4] ss:$8 sps:$4 sm:$0xff]  }
  0x1c   :  { %v402_v27 = vld [vmem:[#allocation2 + $0xb0] ss:$8 sps:$4 sm:$0xff]   ;;  %v403_v28 = vld [vmem:[#allocation2 + $0xc4] ss:$8 sps:$4 sm:$0xff]   ;;  %v405_v29 = vld [vmem:[#allocation2 + $0xc0] ss:$8 sps:$4 sm:$0xff]  }
  0x1d   :  { %248 = vmatpush1.bf16.xpose.msra.mxu0 %v372_v4  ;;  %v406_v30 = vld [vmem:[#allocation2 + $0xd4] ss:$8 sps:$4 sm:$0xff]   ;;  %v408_v31 = vld [vmem:[#allocation2 + $0xd0] ss:$8 sps:$4 sm:$0xff]   ;;  %v409_v32 = vld [vmem:[#allocation2 + $0xe4] ss:$8 sps:$4 sm:$0xff]  }
  0x1e   :  { %249 = vmatprep.subr.bf16.mxu0 %v373_v5  ;;  %v411_v33 = vld [vmem:[#allocation2 + $0xe0] ss:$8 sps:$4 sm:$0xff]   ;;  %v412_v34 = vld [vmem:[#allocation2 + $0xf4] ss:$8 sps:$4 sm:$0xff]   ;;  %v414_v35 = vld [vmem:[#allocation2 + $0xf0] ss:$8 sps:$4 sm:$0xff]  }
  0x1f   :  { %v415_v36 = vld [vmem:[%s533_s0] ss:$8 sps:$4 sm:$0xff]   ;;  %s311_s6 = sshll.u32 %s470_s5, 4  ;;  %s312_s6 = int_to_ptr.vmem [resolvable:$true] %s311_s6 }
  0x20   :  { %s440_s0 = scalar_lea.vmem %s312_s6, 256  ;;  %p445_p9 = scmp.lt.s32.totalorder %s312_s6, %s312_s6 }
  0x21   :  { %p441_p8 = scmp.ne.s32.totalorder %s312_s6, %s440_s0  ;;  %p446_p10 = scmp.lt.s32.totalorder %s440_s0, %s440_s0 }
  0x23   :  { %p447_p11 = por %p446_p10, %p445_p9 }
  0x25   :  { %250 = vmatpush1.bf16.xpose.msra.mxu0 %v375_v6  ;;  %p448_p12 = pnand %p447_p11, %p441_p8 }
  0x26   :  { %251 = vmatprep.subr.bf16.mxu0 %v376_v7 }
  0x2d   :  { %252 = vmatpush1.bf16.xpose.msra.mxu0 %v378_v10 }
  0x2e   :  { %253 = vmatprep.subr.bf16.mxu0 %v379_v11 }
  0x35   :  { %254 = vmatpush1.bf16.xpose.msra.mxu0 %v381_v13 }
  0x36   :  { %255 = vmatprep.subr.bf16.mxu0 %v382_v14 }
  0x3d   :  { %256 = vmatpush1.bf16.xpose.msra.mxu0 %v384_v15 }
  0x3e   :  { %257 = vmatprep.subr.bf16.mxu0 %v385_v16 }
  0x45   :  { %258 = vmatpush1.bf16.xpose.msra.mxu0 %v387_v17 }
  0x46   :  { %259 = vmatprep.subr.bf16.mxu0 %v388_v18 }
  0x4d   :  { %260 = vmatpush1.bf16.xpose.msra.mxu0 %v390_v19 }
  0x4e   :  { %261 = vmatprep.subr.bf16.mxu0 %v391_v20 }
  0x55   :  { %262 = vmatpush1.bf16.xpose.msra.mxu0 %v393_v21 }
  0x56   :  { %263 = vmatprep.subr.bf16.mxu0 %v394_v22 }
  0x5d   :  { %264 = vmatpush1.bf16.xpose.msra.mxu0 %v396_v23 }
  0x5e   :  { %265 = vmatprep.subr.bf16.mxu0 %v397_v24 }
  0x65   :  { %266 = vmatpush1.bf16.xpose.msra.mxu0 %v399_v25 }
  0x66   :  { %267 = vmatprep.subr.bf16.mxu0 %v400_v26 }
  0x6d   :  { %268 = vmatpush1.bf16.xpose.msra.mxu0 %v402_v27 }
  0x6e   :  { %269 = vmatprep.subr.bf16.mxu0 %v403_v28 }
  0x75   :  { %270 = vmatpush1.bf16.xpose.msra.mxu0 %v405_v29 }
  0x76   :  { %271 = vmatprep.subr.bf16.mxu0 %v406_v30 }
  0x7d   :  { %272 = vmatpush1.bf16.xpose.msra.mxu0 %v408_v31 }
  0x7e   :  { %273 = vmatprep.subr.bf16.mxu0 %v409_v32 }
  0x85   :  { %274 = vmatpush1.bf16.xpose.msra.mxu0 %v411_v33 }
  0x86   :  { %275 = vmatprep.subr.bf16.mxu0 %v412_v34 }
  0x8d   :  { %276 = vmatpush1.bf16.xpose.msra.mxu0 %v414_v35 }
  0x94   :  { %278 = vmatmul.mubr.bf16.vlgmr.msra.gmra.mrb[0].mxu0 %v415_v36 }
  0x95   :  { %v68_v37 = vpop.permute.xlu0 %67 }
  0x99   :  { %v73_v41 = vpop.permute.xlu0 %72 }
 0x167   :  { %v279_v38 = vpop.f32.mrb[0].mxu0 }
 0x168   :  { %v280_v39 = vadd.f32 %v279_v38, %v68_v37  ;;  %v281_v40 = vpop.f32.mrb[1].mxu0 }
 0x169   :  { %v282_v42 = vadd.f32 %v281_v40, %v68_v37  ;;  %v283_v43 = vpop.f32.mrb[2].mxu0 }
 0x16a   :  { %v288_v44 = vmax.f32 %v280_v39, 0.0  ;;  %v284_v45 = vadd.f32 %v283_v43, %v73_v41  ;;  %v285_v46 = vpop.f32.mrb[3].mxu0 }
 0x16b   :  { %v289_v47 = vmax.f32 %v282_v42, 0.0  ;;  %v286_v48 = vadd.f32 %v285_v46, %v73_v41 }
 0x16c   :  { %v290_v49 = vmax.f32 %v284_v45, 0.0 }
 0x16d   :  { %v359_v50 = vpack.c.bf16 %v289_v47, %v288_v44  ;;  %v291_v51 = vmax.f32 %v286_v48, 0.0 }
 0x16f   :  { %304 = vst [vmem:[#allocation5] sm:$0xff] %v359_v50  ;;  %v360_v52 = vpack.c.bf16 %v291_v51, %v290_v49 }
 0x171   :  { %305 = vst [vmem:[#allocation5 + $0x8] sm:$0xff] %v360_v52 }
 0x172   :  { %451 = shalt.err (!%p448_p12)
}
 0x173   :  { %s452_s9 = scalar_lea.hbm %s536_s3, 256 }
 0x174   :  { %p453_p13 = scmp.ne.s32.totalorder %s536_s3, %s452_s9  ;;  %p456_p0 = scmp.lt.u32.totalorder %s452_s9, %s536_s3 }
 0x176   :  { %p458_p1 = pnand %p456_p0, %p453_p13 }
 0x178   :  { %461 = shalt.err (!%p458_p1)
}
 0x179   :  { %317 = dma.vmem_to_hbm [thread:$0]  %s312_s6, 256, %s536_s3, [#allocation4], %s467_s22, %s467_s22, %s468_s23  }
 0x17a   :  { %464 = dma.done.wait [#allocation4], 256  }
 0x17b   :  { %465 = vsyncadd [#allocation4], 4294967040 }
 0x17c   :  { %321 = vsyncpa [#allocation3], 1 }
 0x17d   :  { %322 = vsyncpa [#allocation4], 1 }

</bundles_post_ra>
